<compile_context>
chip_gen: v7x
topology: tpu7x:2x2x1
jax: 0.10.0
libtpu: 0.0.40
codegen_flags: <defaults>
</compile_context>

<pallas_src>
import jax
import jax.numpy as jnp
from jax.experimental import pallas as pl
from jax.experimental.pallas import tpu as pltpu

BN_EPS = 1e-5
LANE = 128


def _residual_mlp_kernel(x_ref, w1_ref, b_ref, w2_ref, w3_ref, wo_ref, bo_ref, out_ref):
    cd = w1_ref.dtype  # compute dtype fed to the MXU (bf16); accumulation is f32
    x = x_ref[...]
    b1 = b_ref[0:1, :]
    b2 = b_ref[1:2, :]
    b3 = b_ref[2:3, :]

    # input_layer (BN already folded into w1/b1) + ReLU
    h = jnp.dot(x.astype(cd), w1_ref[...], preferred_element_type=jnp.float32) + b1
    h = jnp.maximum(h, 0.0)

    # residual block 1: ReLU(hidden_layer1(h)) [+ dropout = identity in eval] + h
    res = h
    t = jnp.dot(h.astype(cd), w2_ref[...], preferred_element_type=jnp.float32) + b2
    h = jnp.maximum(t, 0.0) + res
    # TODO(synk): training-mode dropout (Bernoulli mask via pltpu.prng_random_bits,
    # seeded per grid step from pl.program_id) omitted; eval mode is identity.

    # residual block 2
    res = h
    t = jnp.dot(h.astype(cd), w3_ref[...], preferred_element_type=jnp.float32) + b3
    h = jnp.maximum(t, 0.0) + res

    # output_layer (columns padded to a lane-dense slab; wrapper slices)
    out_ref[...] = (jnp.dot(h.astype(cd), wo_ref[...], preferred_element_type=jnp.float32)
                    + bo_ref[...]).astype(out_ref.dtype)


def fold_and_pack_params(params, compute_dtype=jnp.bfloat16):
    """Fold inference-mode BatchNorm into w1/b1, cast weights to bf16, pack biases,
    and pad the output projection to a lane-dense (multiple of 128) width."""
    scale = params["gamma"] * jax.lax.rsqrt(params["running_var"] + BN_EPS)   # (1, H)
    w1 = (params["w1"] * scale).astype(compute_dtype)                         # (in, H)
    b1 = (params["b1"] - params["running_mean"]) * scale + params["beta"]     # (1, H)

    b_stack = jnp.concatenate([b1, params["b2"], params["b3"]], axis=0)       # (3, H) f32

    out_size = params["wo"].shape[1]
    out_pad = max(LANE, pl.cdiv(out_size, LANE) * LANE)
    wo = jnp.pad(params["wo"], ((0, 0), (0, out_pad - out_size))).astype(compute_dtype)
    bo = jnp.pad(params["bo"], ((0, 0), (0, out_pad - out_size)))

    return dict(
        w1=w1,
        w2=params["w2"].astype(compute_dtype),
        w3=params["w3"].astype(compute_dtype),
        wo=wo,
        b=b_stack.astype(jnp.float32),
        bo=bo.astype(jnp.float32),
        out_size=out_size,
    )


def residual_enhanced_nn(x, packed, *, block_batch=512):
    """x: [batch, input_size] f32. packed: output of fold_and_pack_params."""
    batch, in_size = x.shape
    out_pad = packed["wo"].shape[1]
    out_size = packed["out_size"]

    # Batch tile: multiple of 8 sublanes, up to block_batch rows per grid step.
    tb = max(8, (min(block_batch, max(batch, 8)) // 8) * 8)
    padded = pl.cdiv(batch, tb) * tb
    if padded != batch:
        x = jnp.pad(x, ((0, padded - batch), (0, 0)))
    grid = (padded // tb,)

    def resident(arr):  # whole-array block, same block every grid step -> stays in VMEM
        return pl.BlockSpec(arr.shape, lambda i: (0, 0))

    out = pl.pallas_call(
        _residual_mlp_kernel,
        out_shape=jax.ShapeDtypeStruct((padded, out_pad), jnp.float32),
        grid=grid,
        in_specs=[
            pl.BlockSpec((tb, in_size), lambda i: (i, 0)),   # x: tiled over batch
            resident(packed["w1"]),
            resident(packed["b"]),
            resident(packed["w2"]),
            resident(packed["w3"]),
            resident(packed["wo"]),
            resident(packed["bo"]),
        ],
        out_specs=pl.BlockSpec((tb, out_pad), lambda i: (i, 0)),
        compiler_params=pltpu.CompilerParams(
            dimension_semantics=("parallel",),  # megacore split on v7x
        ),
        # NOTE: at production hidden sizes, also set vmem_limit_bytes / K-tile the
        # hidden dimension so 3 HxH weights fit v7x's 64 MiB VMEM.
    )(x, packed["w1"], packed["b"], packed["w2"], packed["w3"],
      packed["wo"], packed["bo"])

    return out[:batch, :out_size]


def init_params(key, input_size, hidden_size, output_size):
    """Deterministic init mimicking PyTorch Linear defaults (uniform +-1/sqrt(fan_in)).
    Linear weights are stored already transposed as [in, out]; biases as [1, out]."""
    ks = jax.random.split(key, 8)

    def linear(kw, kb, fan_in, fan_out):
        bound = 1.0 / jnp.sqrt(fan_in)
        w = jax.random.uniform(kw, (fan_in, fan_out), jnp.float32, -bound, bound)
        b = jax.random.uniform(kb, (1, fan_out), jnp.float32, -bound, bound)
        return w, b

    w1, b1 = linear(ks[0], ks[1], input_size, hidden_size)
    w2, b2 = linear(ks[2], ks[3], hidden_size, hidden_size)
    w3, b3 = linear(ks[4], ks[5], hidden_size, hidden_size)
    wo, bo = linear(ks[6], ks[7], hidden_size, output_size)

    return dict(
        w1=w1, b1=b1,
        gamma=jnp.ones((1, hidden_size), jnp.float32),
        beta=jnp.zeros((1, hidden_size), jnp.float32),
        running_mean=jnp.zeros((1, hidden_size), jnp.float32),
        running_var=jnp.ones((1, hidden_size), jnp.float32),
        w2=w2, b2=b2,
        w3=w3, b3=b3,
        wo=wo, bo=bo,
    )


def _reference_f32(x, p):
    """Pure-f32 PyTorch-equivalent eval forward (BN with running stats, dropout=identity)."""
    h = x @ p["w1"] + p["b1"]
    h = p["gamma"] * (h - p["running_mean"]) * jax.lax.rsqrt(p["running_var"] + BN_EPS) + p["beta"]
    h = jnp.maximum(h, 0.0)
    res = h
    h = jnp.maximum(h @ p["w2"] + p["b2"], 0.0) + res
    res = h
    h = jnp.maximum(h @ p["w3"] + p["b3"], 0.0) + res
    return h @ p["wo"] + p["bo"]


def _reference_packed(x, pk):
    """Reference faithful to the kernel's bf16-weight / f32-accumulate compute."""
    def mm(a, w):
        return jnp.dot(a.astype(w.dtype), w, preferred_element_type=jnp.float32)
    h = jnp.maximum(mm(x, pk["w1"]) + pk["b"][0:1], 0.0)
    res = h
    h = jnp.maximum(mm(h, pk["w2"]) + pk["b"][1:2], 0.0) + res
    res = h
    h = jnp.maximum(mm(h, pk["w3"]) + pk["b"][2:3], 0.0) + res
    return (mm(h, pk["wo"]) + pk["bo"])[:, :pk["out_size"]]


if __name__ == "__main__":
    key = jax.random.PRNGKey(0)
    k_x, k_p = jax.random.split(key)

    batch, input_size, hidden_size, output_size = 16, 16, 32, 8
    x = jax.random.normal(k_x, (batch, input_size), jnp.float32)
    params = init_params(k_p, input_size, hidden_size, output_size)
    packed = fold_and_pack_params(params)

    # block_batch=8 -> 2 grid steps at this toy batch, exercising the pipelined path.
    out = residual_enhanced_nn(x, packed, block_batch=8)
    out = jax.block_until_ready(out)
    assert out.shape == (batch, output_size)

    # Tight check vs a reference doing the exact same bf16-weight / f32-accum math.
    ref_exact = _reference_packed(x, packed)
    assert jnp.allclose(out, ref_exact, atol=2e-3, rtol=2e-3), "mismatch vs bf16-faithful reference"

    # Loose check vs the pure-f32 PyTorch-equivalent forward (bf16 weight quantization error).
    ref_f32 = _reference_f32(x, params)
    assert jnp.allclose(out, ref_f32, atol=5e-2, rtol=5e-2), "mismatch vs f32 module reference"

    print("KERNEL_OK")
</pallas_src>

<mosaic_0001>
module attributes {stable_mosaic.version = 11 : i64} {
  func.func @_residual_mlp_kernel(%arg0: i32, %arg1: memref<8x16xf32, #tpu.memory_space<vmem>>, %arg2: memref<16x32xbf16, #tpu.memory_space<vmem>>, %arg3: memref<3x32xf32, #tpu.memory_space<vmem>>, %arg4: memref<32x32xbf16, #tpu.memory_space<vmem>>, %arg5: memref<32x32xbf16, #tpu.memory_space<vmem>>, %arg6: memref<32x128xbf16, #tpu.memory_space<vmem>>, %arg7: memref<1x128xf32, #tpu.memory_space<vmem>>, %arg8: memref<8x128xf32, #tpu.memory_space<vmem>>) attributes {dimension_semantics = [#tpu.dimension_semantics<parallel>], iteration_bounds = array<i64: 2>, scalar_prefetch = 0 : i64, scratch_operands = 0 : i64, tpu.core_type = #tpu.core_type<tc>, window_params = [{transform_indices = @transform_0, window_bounds = array<i64: 8, 16>}, {pipeline_mode = #tpu.pipeline_mode<synchronous>, transform_indices = @transform_1, window_bounds = array<i64: 16, 32>}, {pipeline_mode = #tpu.pipeline_mode<synchronous>, transform_indices = @transform_2, window_bounds = array<i64: 3, 32>}, {pipeline_mode = #tpu.pipeline_mode<synchronous>, transform_indices = @transform_3, window_bounds = array<i64: 32, 32>}, {pipeline_mode = #tpu.pipeline_mode<synchronous>, transform_indices = @transform_4, window_bounds = array<i64: 32, 32>}, {pipeline_mode = #tpu.pipeline_mode<synchronous>, transform_indices = @transform_5, window_bounds = array<i64: 32, 128>}, {pipeline_mode = #tpu.pipeline_mode<synchronous>, transform_indices = @transform_6, window_bounds = array<i64: 1, 128>}, {transform_indices = @transform_7, window_bounds = array<i64: 8, 128>}]} {
    %c0 = arith.constant 0 : index
    %c0_0 = arith.constant 0 : index
    %0 = vector.load %arg1[%c0, %c0_0] : memref<8x16xf32, #tpu.memory_space<vmem>>, vector<8x16xf32>
    %c0_1 = arith.constant 0 : index
    %c0_2 = arith.constant 0 : index
    %1 = vector.load %arg3[%c0_1, %c0_2] : memref<3x32xf32, #tpu.memory_space<vmem>>, vector<1x32xf32>
    %c1 = arith.constant 1 : index
    %c0_3 = arith.constant 0 : index
    %2 = vector.load %arg3[%c1, %c0_3] : memref<3x32xf32, #tpu.memory_space<vmem>>, vector<1x32xf32>
    %c2 = arith.constant 2 : index
    %c0_4 = arith.constant 0 : index
    %3 = vector.load %arg3[%c2, %c0_4] : memref<3x32xf32, #tpu.memory_space<vmem>>, vector<1x32xf32>
    %4 = arith.truncf %0 : vector<8x16xf32> to vector<8x16xbf16>
    %c0_5 = arith.constant 0 : index
    %c0_6 = arith.constant 0 : index
    %5 = vector.load %arg2[%c0_5, %c0_6] : memref<16x32xbf16, #tpu.memory_space<vmem>>, vector<16x32xbf16>
    %cst = arith.constant dense<0.000000e+00> : vector<8x32xf32>
    %6 = tpu.matmul %4, %5, %cst {dimension_numbers = #tpu.dot_dimension_numbers<[1], [0], [0], [1], [0, 0, 1, 1], [], []>} : vector<8x16xbf16>, vector<16x32xbf16>, vector<8x32xf32> -> vector<8x32xf32>
    %7 = vector.broadcast %1 : vector<1x32xf32> to vector<8x32xf32>
    %8 = arith.addf %6, %7 : vector<8x32xf32>
    %cst_7 = arith.constant 0.000000e+00 : f32
    %9 = vector.broadcast %cst_7 : f32 to vector<8x32xf32>
    %10 = arith.maximumf %8, %9 : vector<8x32xf32>
    %11 = arith.truncf %10 : vector<8x32xf32> to vector<8x32xbf16>
    %c0_8 = arith.constant 0 : index
    %c0_9 = arith.constant 0 : index
    %12 = vector.load %arg4[%c0_8, %c0_9] : memref<32x32xbf16, #tpu.memory_space<vmem>>, vector<32x32xbf16>
    %cst_10 = arith.constant dense<0.000000e+00> : vector<8x32xf32>
    %13 = tpu.matmul %11, %12, %cst_10 {dimension_numbers = #tpu.dot_dimension_numbers<[1], [0], [0], [1], [0, 0, 1, 1], [], []>} : vector<8x32xbf16>, vector<32x32xbf16>, vector<8x32xf32> -> vector<8x32xf32>
    %14 = vector.broadcast %2 : vector<1x32xf32> to vector<8x32xf32>
    %15 = arith.addf %13, %14 : vector<8x32xf32>
    %cst_11 = arith.constant 0.000000e+00 : f32
    %16 = vector.broadcast %cst_11 : f32 to vector<8x32xf32>
    %17 = arith.maximumf %15, %16 : vector<8x32xf32>
    %18 = arith.addf %17, %10 : vector<8x32xf32>
    %19 = arith.truncf %18 : vector<8x32xf32> to vector<8x32xbf16>
    %c0_12 = arith.constant 0 : index
    %c0_13 = arith.constant 0 : index
    %20 = vector.load %arg5[%c0_12, %c0_13] : memref<32x32xbf16, #tpu.memory_space<vmem>>, vector<32x32xbf16>
    %cst_14 = arith.constant dense<0.000000e+00> : vector<8x32xf32>
    %21 = tpu.matmul %19, %20, %cst_14 {dimension_numbers = #tpu.dot_dimension_numbers<[1], [0], [0], [1], [0, 0, 1, 1], [], []>} : vector<8x32xbf16>, vector<32x32xbf16>, vector<8x32xf32> -> vector<8x32xf32>
    %22 = vector.broadcast %3 : vector<1x32xf32> to vector<8x32xf32>
    %23 = arith.addf %21, %22 : vector<8x32xf32>
    %cst_15 = arith.constant 0.000000e+00 : f32
    %24 = vector.broadcast %cst_15 : f32 to vector<8x32xf32>
    %25 = arith.maximumf %23, %24 : vector<8x32xf32>
    %26 = arith.addf %25, %18 : vector<8x32xf32>
    %27 = arith.truncf %26 : vector<8x32xf32> to vector<8x32xbf16>
    %c0_16 = arith.constant 0 : index
    %c0_17 = arith.constant 0 : index
    %28 = vector.load %arg6[%c0_16, %c0_17] : memref<32x128xbf16, #tpu.memory_space<vmem>>, vector<32x128xbf16>
    %cst_18 = arith.constant dense<0.000000e+00> : vector<8x128xf32>
    %29 = tpu.matmul %27, %28, %cst_18 {dimension_numbers = #tpu.dot_dimension_numbers<[1], [0], [0], [1], [0, 0, 1, 1], [], []>} : vector<8x32xbf16>, vector<32x128xbf16>, vector<8x128xf32> -> vector<8x128xf32>
    %c0_19 = arith.constant 0 : index
    %c0_20 = arith.constant 0 : index
    %30 = vector.load %arg7[%c0_19, %c0_20] : memref<1x128xf32, #tpu.memory_space<vmem>>, vector<1x128xf32>
    %31 = vector.broadcast %30 : vector<1x128xf32> to vector<8x128xf32>
    %32 = arith.addf %29, %31 : vector<8x128xf32>
    %c0_21 = arith.constant 0 : index
    %c0_22 = arith.constant 0 : index
    %33 = vector.load %arg8[%c0_21, %c0_22] : memref<8x128xf32, #tpu.memory_space<vmem>>, vector<8x128xf32>
    tpu.vector_store %arg8[%c0_21, %c0_22], %32 {strides = array<i32>} : memref<8x128xf32, #tpu.memory_space<vmem>>, vector<8x128xf32>,
    return
  }
  func.func @transform_0(%arg0: i32) -> (i32, i32) {
    %c0_i32 = arith.constant 0 : i32
    %c0_i32_0 = arith.constant 0 : i32
    return %arg0, %c0_i32 : i32, i32
  }
  func.func @transform_1(%arg0: i32) -> (i32, i32) {
    %c0_i32 = arith.constant 0 : i32
    %c0_i32_0 = arith.constant 0 : i32
    %c0_i32_1 = arith.constant 0 : i32
    return %c0_i32, %c0_i32_0 : i32, i32
  }
  func.func @transform_2(%arg0: i32) -> (i32, i32) {
    %c0_i32 = arith.constant 0 : i32
    %c0_i32_0 = arith.constant 0 : i32
    %c0_i32_1 = arith.constant 0 : i32
    return %c0_i32, %c0_i32_0 : i32, i32
  }
  func.func @transform_3(%arg0: i32) -> (i32, i32) {
    %c0_i32 = arith.constant 0 : i32
    %c0_i32_0 = arith.constant 0 : i32
    %c0_i32_1 = arith.constant 0 : i32
    return %c0_i32, %c0_i32_0 : i32, i32
  }
  func.func @transform_4(%arg0: i32) -> (i32, i32) {
    %c0_i32 = arith.constant 0 : i32
    %c0_i32_0 = arith.constant 0 : i32
    %c0_i32_1 = arith.constant 0 : i32
    return %c0_i32, %c0_i32_0 : i32, i32
  }
  func.func @transform_5(%arg0: i32) -> (i32, i32) {
    %c0_i32 = arith.constant 0 : i32
    %c0_i32_0 = arith.constant 0 : i32
    %c0_i32_1 = arith.constant 0 : i32
    return %c0_i32, %c0_i32_0 : i32, i32
  }
  func.func @transform_6(%arg0: i32) -> (i32, i32) {
    %c0_i32 = arith.constant 0 : i32
    %c0_i32_0 = arith.constant 0 : i32
    %c0_i32_1 = arith.constant 0 : i32
    return %c0_i32, %c0_i32_0 : i32, i32
  }
  func.func @transform_7(%arg0: i32) -> (i32, i32) {
    %c0_i32 = arith.constant 0 : i32
    %c0_i32_0 = arith.constant 0 : i32
    return %arg0, %c0_i32 : i32, i32
  }
}

</mosaic_0001>

<bundles_post_ra>
// kernel: tpu_custom_call.1
= control target key start
LH: loop header
LB: loop body
LE: loop exit
PB: predicated region body
PF: predicated region fallthrough
CT: control target
= control target key end

     0   :  { %12 = vsyncpa [#allocation3], 0  ;;  %s1487_s0 = inlined_call_operand.hbm [shape: f32[16,16], index: 0, kind: input, shape index: {}]   ;;  %s1488_s1 = inlined_call_operand.hbm [shape: bf16[16,32], index: 1, kind: input, shape index: {}]   ;;  %s1489_s2 = inlined_call_operand.hbm [shape: f32[3,32], index: 2, kind: input, shape index: {}]   ;;  %s1490_s3 = inlined_call_operand.hbm [shape: bf16[32,32], index: 3, kind: input, shape index: {}]   ;;  %s1491_s4 = inlined_call_operand.hbm [shape: bf16[32,32], index: 4, kind: input, shape index: {}]   ;;  %s1492_s5 = inlined_call_operand.vmem [shape: bf16[32,128], index: 5, kind: input, shape index: {}]   ;;  %s1493_s6 = inlined_call_operand.vmem [shape: f32[1,128], index: 6, kind: input, shape index: {}]   ;;  %s1494_s7 = inlined_call_operand.hbm [shape: f32[16,128], index: 7, kind: output, shape index: {}]  }
   0x1   :  { %14 = vsyncpa [#allocation3 + $0x1], 0 }
   0x2   :  { %15 = vsyncpa [#allocation6], 0 }
   0x3   :  { %16 = vsyncpa [#allocation9], 0 }
   0x4   :  { %17 = vsyncpa [#allocation4], 0 }
   0x5   :  { %19 = vsyncpa [#allocation4 + $0x1], 0  ;;  %s1178_s24 = smov 0   ;;  %s1180_s25 = smov 0  }
   0x6   :  { %s1182_s26 = smov 0   ;;  %s1184_s27 = smov 0  }
   0x7 LB: > { %s1128_s28 = smov [#allocation5]   ;;  %s1199_s30 = sadd.s32 4294967295, %s1126_s27   ;;  %s1126_s27 = sphi %s1184_s27, %s1518_s27   ;;  %s1122_s26 = sphi %s1182_s26, %s1517_s26   ;;  %s1118_s25 = sphi %s1180_s25, %s1516_s25   ;;  %s1114_s24 = sphi %s1178_s24, %s1515_s24  }
   0x8   : > { %s220_s29 = sshll.u32 %s1128_s28, 4  ;;  %p737_p0 = scmp.ge.s32.totalorder %s1126_s27, 1  ;;  %s1204_s29 = int_to_ptr.vmem [resolvable:$true] %s220_s29 }
   0x9   : > { %p1495_p1 = scmp.eq.s32.totalorder %s1199_s30, 0  ;;  %p208_p2 = scmp.lt.s32.totalorder %s1126_s27, 3 }
   0xa   : > { %s1129_s9 = smov [#allocation8]   ;;  %s1130_s12 = smov [#allocation7]  }
   0xb   : > { %p1206_p3 = pnand %p737_p0, %p208_p2  ;;  %s244_s10 = sshll.u32 %s1129_s9, 4  ;;  %s1219_s10 = int_to_ptr.vmem [resolvable:$true] %s244_s10 }
   0xc   : > { %s234_s13 = sshll.u32 %s1130_s12, 4  ;;  %s910_s16 = scalar_lea.hbm %s1488_s1, 128  ;;  %s1221_s13 = int_to_ptr.vmem [resolvable:$true] %s234_s13 }
   0xd   : > { %s1498_s8 = scalar_select %p1206_p3, 1, 0 }
   0xe   : > { %p832_p5 = pneg %p1206_p3  ;;  %p911_p7 = scmp.ne.s32.totalorder %s1488_s1, %s910_s16 }
   0xf   : > { %p917_p11 = scmp.lt.u32.totalorder %s910_s16, %s1488_s1 }
  0x10   : > { %p1215_p6 = pnand %p832_p5, %p1495_p1 }
  0x12   : > { %p1231_p8 = pneg %p1215_p6 }
  0x14   : > { %p913_p9 = pnand %p1231_p8, %p911_p7 }
  0x16   : > { %p914_p10 = pneg %p913_p9 }
  0x18   : > { %p919_p12 = pnand %p917_p11, %p914_p10 }
  0x1a   : > { %922 = shalt.err (!%p919_p12)
}
  0x1b   : > { %s923_s22 = scalar_lea.vmem %s1204_s29, 128  ;;  %p931_p5 = scmp.lt.s32.totalorder %s1204_s29, %s1204_s29 }
  0x1c   : > { %p924_p13 = scmp.ne.s32.totalorder %s1204_s29, %s923_s22  ;;  %p932_p4 = scmp.lt.s32.totalorder %s923_s22, %s923_s22 }
  0x1e   : > { %p926_p0 = pnand %p924_p13, %p1231_p8  ;;  %p933_p7 = por %p932_p4, %p931_p5 }
  0x20   : > { %p927_p2 = pneg %p926_p0 }
  0x22   : > { %p934_p9 = pnand %p933_p7, %p927_p2 }
  0x24   : > { %937 = shalt.err (!%p934_p9)
}
  0x25   : > { %s1131_s23 = smov 64   ;;  %s1132_s28 = smov 4  }
  0x26   : > { %835 = dma.hbm_to_vmem [thread:$0]  (!%p1215_p6), %s1488_s1, 128, %s1204_s29, [#allocation6], %s1131_s23, %s1131_s23, %s1132_s28  }
  0x27   : > { %s938_s16 = scalar_lea.hbm %s1490_s3, 256 }
  0x28   : > { %p939_p4 = scmp.ne.s32.totalorder %s1490_s3, %s938_s16  ;;  %p945_p12 = scmp.lt.u32.totalorder %s938_s16, %s1490_s3 }
  0x2a   : > { %p941_p10 = pnand %p939_p4, %p1231_p8 }
  0x2c   : > { %p942_p11 = pneg %p941_p10 }
  0x2e   : > { %p947_p13 = pnand %p945_p12, %p942_p11 }
  0x30   : > { %950 = shalt.err (!%p947_p13)
}
  0x31   : > { %s951_s29 = scalar_lea.vmem %s1219_s10, 256  ;;  %p959_p7 = scmp.lt.s32.totalorder %s1219_s10, %s1219_s10 }
  0x32   : > { %p952_p0 = scmp.ne.s32.totalorder %s1219_s10, %s951_s29  ;;  %p960_p9 = scmp.lt.s32.totalorder %s951_s29, %s951_s29 }
  0x34   : > { %p954_p2 = pnand %p952_p0, %p1231_p8  ;;  %p961_p4 = por %p960_p9, %p959_p7 }
  0x36   : > { %p955_p5 = pneg %p954_p2 }
  0x38   : > { %p962_p10 = pnand %p961_p4, %p955_p5 }
  0x3a   : > { %965 = shalt.err (!%p962_p10)
}
  0x3b   : > { %841 = dma.hbm_to_vmem [thread:$0]  (!%p1215_p6), %s1490_s3, 256, %s1219_s10, [#allocation9], %s1131_s23, %s1131_s23, %s1132_s28  }
  0x3c   : > { %s966_s15 = scalar_lea.hbm %s1489_s2, 64 }
  0x3d   : > { %p967_p11 = scmp.ne.s32.totalorder %s1489_s2, %s966_s15  ;;  %p973_p0 = scmp.lt.u32.totalorder %s966_s15, %s1489_s2 }
  0x3f   : > { %p969_p12 = pnand %p967_p11, %p1231_p8 }
  0x41   : > { %p970_p13 = pneg %p969_p12 }
  0x43   : > { %p975_p2 = pnand %p973_p0, %p970_p13 }
  0x45   : > { %978 = shalt.err (!%p975_p2)
}
  0x46   : > { %s979_s10 = scalar_lea.vmem %s1221_s13, 64  ;;  %p987_p4 = scmp.lt.s32.totalorder %s1221_s13, %s1221_s13 }
  0x47   : > { %p980_p5 = scmp.ne.s32.totalorder %s1221_s13, %s979_s10  ;;  %p988_p10 = scmp.lt.s32.totalorder %s979_s10, %s979_s10 }
  0x49   : > { %p982_p7 = pnand %p980_p5, %p1231_p8  ;;  %p989_p11 = por %p988_p10, %p987_p4 }
  0x4b   : > { %p983_p9 = pneg %p982_p7 }
  0x4d   : > { %p990_p12 = pnand %p989_p11, %p983_p9 }
  0x4f   : > { %993 = shalt.err (!%p990_p12)
}
  0x50   : > { %838 = dma.hbm_to_vmem [thread:$0]  (!%p1215_p6), %s1489_s2, 64, %s1221_s13, [#allocation6]  }
  0x51   : > { %s1133_s22 = smov [#allocation10]   ;;  %s994_s15 = scalar_lea.hbm %s1491_s4, 256 }
  0x52   : > { %s257_s9 = sshll.u32 %s1133_s22, 4  ;;  %p995_p13 = scmp.ne.s32.totalorder %s1491_s4, %s994_s15  ;;  %s258_s9 = int_to_ptr.vmem [resolvable:$true] %s257_s9 }
  0x53   : > { %p1001_p5 = scmp.lt.u32.totalorder %s994_s15, %s1491_s4 }
  0x54   : > { %p997_p0 = pnand %p995_p13, %p1231_p8 }
  0x56   : > { %p998_p2 = pneg %p997_p0 }
  0x58   : > { %p1003_p7 = pnand %p1001_p5, %p998_p2 }
  0x5a   : > { %1006 = shalt.err (!%p1003_p7)
}
  0x5b   : > { %s1007_s13 = scalar_lea.vmem %s258_s9, 256  ;;  %p1015_p11 = scmp.lt.s32.totalorder %s258_s9, %s258_s9 }
  0x5c   : > { %p1008_p9 = scmp.ne.s32.totalorder %s258_s9, %s1007_s13  ;;  %p1016_p12 = scmp.lt.s32.totalorder %s1007_s13, %s1007_s13 }
  0x5e   : > { %p1010_p4 = pnand %p1008_p9, %p1231_p8  ;;  %p1017_p1 = por %p1016_p12, %p1015_p11 }
  0x60   : > { %p1011_p10 = pneg %p1010_p4 }
  0x62   : > { %p1018_p3 = pnand %p1017_p1, %p1011_p10 }
  0x64   : > { %1021 = shalt.err (!%p1018_p3)
}
  0x65   : > { %844 = dma.hbm_to_vmem [thread:$0]  (!%p1215_p6), %s1491_s4, 256, %s258_s9, [#allocation9], %s1131_s23, %s1131_s23, %s1132_s28  }
  0x66   : > { %s736_s11 = sadd.s32 4294967294, %s1126_s27   ;;  %s1327_s19 = sadd.s32 1, %s1126_s27  }
  0x67   : > { %s29_s29 = ssub.s32 %s1126_s27, %s1327_s19  ;;  %s32_s22 = sadd.s32 1, %s1122_s26 }
  0x68   : > { %p30_p1 = scmp.eq.s32.totalorder %s29_s29, 0  ;;  %p39_p3 = scmp.ne.s32.totalorder %s1122_s26, %s1118_s25 }
  0x69   : > { %p40_p8 = scmp.eq.s32.totalorder %s1126_s27, 0  ;;  %p45_p13 = scmp.ne.s32.totalorder %s1118_s25, %s1114_s24 }
  0x6a   : > { %s1338_s12 = scalar_select %p30_p1, %s1122_s26, %s32_s22  }
  0x6b   : > { %p1340_p0 = por %p40_p8, %p39_p3  ;;  %p1502_p2 = scmp.eq.s32.totalorder %s1199_s30, 0 }
  0x6c   : > { %p195_p5 = scmp.eq.s32.totalorder %s1199_s30, 1  ;;  %p201_p7 = scmp.eq.s32.totalorder %s736_s11, 1 }
  0x6d   : > { %p1346_p6 = por %p1502_p2, %p45_p13  ;;  %p857_p9 = scmp.lt.s32.totalorder %s1126_s27, 2 }
  0x6e   : > { %s277_s28 = sand.u32 1, %s1122_s26   ;;  %p1353_p4 = por %p195_p5, %p39_p3 }
  0x6f   : > { %p1357_p10 = por %p201_p7, %p45_p13  ;;  %s743_s16 = sshll.u32 %s277_s28, 3 }
  0x70   : > { %s1504_s9 = scalar_select %p1353_p4, 1, 0 }
  0x71   : > { %s1505_s15 = scalar_select %p1357_p10, 1, 0 }
  0x72   : > { %s744_s17 = sshll.u32 %s1126_s27, 7  ;;  %s281_s10 = scalar_lea.vmem [#allocation2], %s743_s16 }
  0x73   : > { %s1365_s13 = scalar_lea.hbm %s1487_s0, %s744_s17  ;;  %s288_s21 = sshll.u32 %s281_s10, 4  ;;  %s1367_s21 = int_to_ptr.vmem [resolvable:$true] %s288_s21 }
  0x74   : > { %p1371_p11 = pnand %p857_p9, %p1340_p0  ;;  %s278_s29 = scalar_lea.sflag [#allocation3], %s277_s28 }
  0x75   : > { %s1022_s22 = scalar_lea.hbm %s1365_s13, 128  ;;  %s1027_s18 = scalar_lea.hbm %s1487_s0, 256 }
  0x76   : > { %p1023_p12 = scmp.ne.s32.totalorder %s1365_s13, %s1022_s22  ;;  %p1024_p1 = pneg %p1371_p11 }
  0x77   : > { %p1028_p13 = scmp.lt.u32.totalorder %s1365_s13, %s1487_s0  ;;  %p1029_p0 = scmp.lt.u32.totalorder %s1027_s18, %s1022_s22 }
  0x78   : > { %p1025_p3 = pnand %p1024_p1, %p1023_p12  ;;  %p1031_p5 = scmp.lt.u32.totalorder %s1022_s22, %s1365_s13 }
  0x79   : > { %p1030_p2 = por %p1029_p0, %p1028_p13 }
  0x7a   : > { %p1026_p8 = pneg %p1025_p3 }
  0x7b   : > { %p1032_p7 = por %p1031_p5, %p1030_p2 }
  0x7d   : > { %p1033_p9 = pnand %p1032_p7, %p1026_p8 }
  0x7f   : > { %1036 = shalt.err (!%p1033_p9)
}
  0x80   : > { %s1037_s28 = scalar_lea.vmem %s1367_s21, 128  ;;  %s1134_s10 = smov [#allocation2]  }
  0x81   : > { %p1038_p12 = scmp.ne.s32.totalorder %s1367_s21, %s1037_s28  ;;  %s1042_s16 = sshll.u32 %s1134_s10, 4  ;;  %s1043_s16 = int_to_ptr.vmem [resolvable:$false] %s1042_s16 }
  0x82   : > { %s1044_s17 = scalar_lea.vmem %s1043_s16, 256  ;;  %p1045_p4 = scmp.lt.s32.totalorder %s1367_s21, %s1043_s16 }
  0x83   : > { %p1040_p3 = pnand %p1038_p12, %p1024_p1  ;;  %p1046_p13 = scmp.lt.s32.totalorder %s1044_s17, %s1037_s28 }
  0x85   : > { %p1041_p10 = pneg %p1040_p3  ;;  %p1047_p0 = por %p1046_p13, %p1045_p4 }
  0x87   : > { %p1048_p2 = pnand %p1047_p0, %p1041_p10 }
  0x89   : > { %1051 = shalt.err (!%p1048_p2)
}
  0x8a   : > { %848 = dma.hbm_to_vmem [thread:$0]  (!%p1371_p11), %s1365_s13, 128, %s1367_s21, %s278_s29  }
  0x8b   : > { %p1507_p8 = scmp.ne.s32.totalorder %s1498_s8, 0 }
  0x8c   : > { %s1403_s22 = sand.u32 (!%p1507_p8), 1, %s1118_s25  }
  0x8d   : > { %297 = sbr.rel (%p1507_p8) target bundleno = 1047 (0x417), region = 48  ;;  %s746_s18 = sshll.u32 (!%p1507_p8), %s1403_s22, 3 }
  0x8e   : > { %s300_s14 = scalar_lea.sflag (!%p1507_p8), [#allocation3], %s1403_s22  ;;  %s303_s20 = scalar_lea.vmem (!%p1507_p8), [#allocation2], %s746_s18 }
  0x94   : > { %1097 = dma.done.wait (%p1346_p6), %s300_s14, 128  }
  0x95   : > { %1099 = vsyncadd (%p1346_p6), %s300_s14, 4294967168  ;;  %p1508_p4 = scmp.eq.s32.totalorder %s1199_s30, 0 }
  0x97   : > { %1101 = dma.done.wait (%p1508_p4), [#allocation6], 192   ;;  %p1509_p10 = pmov %p1508_p4 }
  0x98   : > { %p1510_p11 = pmov %p1508_p4 }
  0x99   : > { %1103 = vsyncadd (%p1509_p10), [#allocation6], 4294967104 }
  0x9a   : > { %1105 = dma.done.wait (%p1510_p11), [#allocation9], 512   ;;  %p1511_p1 = pmov %p1508_p4 }
  0x9b   : > { %v1135_v0 = vmov 0.0   ;;  %vm1136_vm0 = vmmov 0   ;;  %v903_v1 = vld [vmem:[#allocation5] sm:$0xff]   ;;  %v351_v2 = vld [vmem:[%s303_s20] sm:$0xff]  ;;  %vm368_vm1 = vcmask 130048   ;;  %vm434_vm2 = vcmask 261120  }
  0x9c   : > { %1107 = vsyncadd (%p1511_p1), [#allocation9], 4294966784  ;;  %782 = vmatprep.subr.bf16.mxu0 %v1135_v0  ;;  %784 = vmatprep.mubr.msk.bf16.mxu0 %vm1136_vm0, %v1135_v0  ;;  %v355_v3 = vpack.c.bf16 %v351_v2, %v351_v2  ;;  %v904_v4 = vld [vmem:[#allocation8] sm:$0xff]   ;;  %v905_v5 = vld [vmem:[#allocation8 + $0x8] sm:$0xff]   ;;  %s768_s28 = sshll.u32 %s1199_s30, 7  ;;  %s349_s10 = scalar_lea.vmem [#allocation11], %s746_s18 }
  0x9d   : > { %788 = vmatprep.subr.bf16.mxu1 %v1135_v0  ;;  %792 = vmatprep.mubr.msk.bf16.mxu1 %vm1136_vm0, %v1135_v0  ;;  %v752_v6 = vld [vmem:[#allocation7] ss:$0 sm:$0xff]  ;;  %v906_v14 = vld [vmem:[#allocation10] sm:$0xff]   ;;  %v755_v16 = vld [vmem:[#allocation7 + $0x1] ss:$0 sm:$0xff]  ;;  %s628_s16 = sshll.u32 %s349_s10, 4  ;;  %s1443_s20 = scalar_lea.hbm %s1494_s7, %s768_s28  ;;  %s1445_s16 = int_to_ptr.vmem [resolvable:$true] %s628_s16 }
  0x9e   : > { %783 = vmatpush3.bf16.msra.mxu0 %v903_v1  ;;  %789 = vmatpush3.bf16.msra.mxu1 %v904_v4  ;;  %v907_v15 = vld [vmem:[#allocation10 + $0x8] sm:$0xff]   ;;  %v908_v25 = vld [vmem:[%s1492_s5] sm:$0xff]   ;;  %v909_v26 = vld [vmem:[%s1492_s5 + $0x8] sm:$0xff]   ;;  %s615_s30 = scalar_lea.sflag [#allocation4], %s1403_s22  ;;  %s1052_s8 = scalar_lea.vmem %s1445_s16, 128 }
  0x9f   : > { %796 = vmatprep.subr.bf16.mxu0 %v1135_v0  ;;  %790 = vmatprep.subr.bf16.mxu1 %v1135_v0  ;;  %v759_v27 = vld [vmem:[#allocation7 + $0x2] ss:$0 sm:$0xff]  ;;  %v763_v36 = vld [vmem:[%s1493_s6] ss:$0 sm:$0xff]  ;;  %p1053_p6 = scmp.ne.s32.totalorder %s1445_s16, %s1052_s8  ;;  %p1512_p5 = scmp.ne.s32.totalorder %s1504_s9, 0 }
  0xa0   : > { %s1137_s18 = smov [#allocation11]  }
  0xa1   : > { %785 = vmatmul.mubr.msk.bf16.vlgmr.msra.gmra.mrb[0].mxu0 %vm368_vm1, %v355_v3  ;;  %p1054_p7 = pnand %p1053_p6, %p1512_p5  ;;  %s1056_s23 = sshll.u32 %s1137_s18, 4  ;;  %s1057_s23 = int_to_ptr.vmem [resolvable:$false] %s1056_s23 }
  0xa2   : > { %800 = vmatprep.mubr.msk.bf16.mxu0 %vm1136_vm0, %v1135_v0  ;;  %791 = vmatpush3.bf16.msra.mxu1 %v905_v5  ;;  %s1058_s13 = scalar_lea.vmem %s1057_s23, 256  ;;  %p1059_p12 = scmp.lt.s32.totalorder %s1445_s16, %s1057_s23 }
  0xa3   : > { %804 = vmatprep.subr.bf16.mxu1 %v1135_v0  ;;  %797 = vmatpush3.bf16.msra.mxu0 %v906_v14  ;;  %p1055_p9 = pneg %p1054_p7  ;;  %p1060_p3 = scmp.lt.s32.totalorder %s1058_s13, %s1052_s8 }
  0xa4   : > { %798 = vmatprep.subr.bf16.mxu0 %v1135_v0 }
  0xa5   : > { %p1061_p13 = por %p1060_p3, %p1059_p12 }
  0xa7   : > { %799 = vmatpush3.bf16.msra.mxu0 %v907_v15  ;;  %p1062_p0 = pnand %p1061_p13, %p1055_p9 }
 0x174   : > { %v406_v7 = vpop.f32.mrb[0].mxu0 }
 0x175   : > { %v407_v8 = vadd.f32 %v752_v6, %v406_v7  ;;  %v786_v9 = vpop.f32.mrb[1].mxu0 }
 0x176   : > { %v409_v10 = vpop.f32.mrb[2].mxu0 }
 0x177   : > { %v412_v11 = vmax.f32 %v407_v8, 0.0  ;;  %v787_v12 = vpop.f32.mrb[3].mxu0 }
 0x179   : > { %v413_v13 = vpack.c.bf16 %v412_v11, %v412_v11 }
 0x17b   : > { %793 = vmatmul.mubr.msk.bf16.vlgmr.msra.gmra.mrb[0].mxu1 %vm434_vm2, %v413_v13 }
 0x17c   : > { %808 = vmatprep.mubr.msk.bf16.mxu1 %vm1136_vm0, %v1135_v0  ;;  %805 = vmatpush3.bf16.msra.mxu1 %v908_v25 }
 0x17d   : > { %806 = vmatprep.subr.bf16.mxu1 %v1135_v0 }
 0x180   : > { %807 = vmatpush3.bf16.msra.mxu1 %v909_v26 }
 0x24e   : > { %v472_v17 = vpop.f32.mrb[0].mxu1 }
 0x24f   : > { %v473_v18 = vadd.f32 %v755_v16, %v472_v17  ;;  %v794_v19 = vpop.f32.mrb[1].mxu1 }
 0x250   : > { %v475_v20 = vpop.f32.mrb[2].mxu1 }
 0x251   : > { %v478_v21 = vmax.f32 %v473_v18, 0.0  ;;  %v795_v22 = vpop.f32.mrb[3].mxu1 }
 0x253   : > { %v479_v23 = vadd.f32 %v478_v21, %v412_v11 }
 0x255   : > { %v480_v24 = vpack.c.bf16 %v479_v23, %v479_v23 }
 0x257   : > { %801 = vmatmul.mubr.msk.bf16.vlgmr.msra.gmra.mrb[4].mxu0 %vm434_vm2, %v480_v24 }
 0x32a   : > { %v538_v28 = vpop.f32.mrb[4].mxu0 }
 0x32b   : > { %v539_v29 = vadd.f32 %v759_v27, %v538_v28  ;;  %v802_v30 = vpop.f32.mrb[5].mxu0 }
 0x32c   : > { %v541_v31 = vpop.f32.mrb[6].mxu0 }
 0x32d   : > { %v544_v32 = vmax.f32 %v539_v29, 0.0  ;;  %v803_v33 = vpop.f32.mrb[7].mxu0 }
 0x32f   : > { %v545_v34 = vadd.f32 %v544_v32, %v479_v23 }
 0x331   : > { %v546_v35 = vpack.c.bf16 %v545_v34, %v545_v34 }
 0x333   : > { %809 = vmatmul.mubr.msk.bf16.vlgmr.msra.gmra.mrb[4].mxu1 %vm434_vm2, %v546_v35 }
 0x406   : > { %v607_v37 = vpop.f32.mrb[4].mxu1 }
 0x407   : > { %v608_v38 = vadd.f32 %v763_v36, %v607_v37  ;;  %v810_v39 = vpop.f32.mrb[5].mxu1 }
 0x408   : > { %v610_v40 = vpop.f32.mrb[6].mxu1 }
 0x409   : > { %613 = vst [vmem:[%s349_s10] sm:$0xff] %v608_v38  ;;  %v811_v41 = vpop.f32.mrb[7].mxu1 }
 0x40a   : > { %1065 = shalt.err (!%p1062_p0)
}
 0x40b   : > { %s1066_s22 = scalar_lea.hbm %s1443_s20, 128  ;;  %s1070_s29 = scalar_lea.hbm %s1494_s7, 256 }
 0x40c   : > { %p1067_p2 = scmp.ne.s32.totalorder %s1443_s20, %s1066_s22  ;;  %p1071_p10 = scmp.lt.u32.totalorder %s1443_s20, %s1494_s7 }
 0x40d   : > { %p1072_p11 = scmp.lt.u32.totalorder %s1070_s29, %s1066_s22  ;;  %p1074_p6 = scmp.lt.u32.totalorder %s1066_s22, %s1443_s20 }
 0x40e   : > { %p1068_p8 = pnand %p1067_p2, %p1512_p5 }
 0x40f   : > { %p1073_p1 = por %p1072_p11, %p1071_p10 }
 0x410   : > { %p1069_p4 = pneg %p1068_p8 }
 0x411   : > { %p1075_p7 = por %p1074_p6, %p1073_p1 }
 0x413   : > { %p1076_p9 = pnand %p1075_p7, %p1069_p4 }
 0x415   : > { %1079 = shalt.err (!%p1076_p9)
}
 0x416   : > { %830 = dma.vmem_to_hbm [thread:$0]  (%p1512_p5), %s1445_s16, 128, %s1443_s20, %s615_s30  }
 0x417 PF: > { %s640_s17 = sand.u32 1, %s1114_s24   ;;  %p1513_p12 = scmp.ne.s32.totalorder %s1505_s15, 0 }
 0x418   : > { %p1514_p3 = scmp.ge.s32.totalorder %s1126_s27, 2  ;;  %s641_s14 = scalar_lea.sflag [#allocation4], %s640_s17 }
 0x41a   : > { %p850_p13 = pnand %p1514_p3, %p1513_p12 }
 0x41c   : > { %1109 = dma.done.wait (!%p850_p13), %s641_s14, 128  }
 0x41d   : > { %1111 = vsyncadd (!%p850_p13), %s641_s14, 4294967168  ;;  %p22_p0 = scmp.ge.s32.totalorder %s1327_s19, 4   ;;  %s1515_s24 = smov %s1118_s25 }
 0x41e   : > { %s1516_s25 = smov %s1122_s26  ;;  %s1517_s26 = smov %s1338_s12 }
 0x41f   : > { %s1518_s27 = smov %s1327_s19  ;;  %24 = sbr.rel (!%p22_p0) target bundleno = 7 (0x7), region = 109 }
 0x426   :  { %646 = vsyncpa [#allocation3], 1 }
 0x427   :  { %648 = vsyncpa [#allocation3 + $0x1], 1 }
 0x428   :  { %649 = vsyncpa [#allocation6], 1 }
 0x429   :  { %650 = vsyncpa [#allocation9], 1 }
 0x42a   :  { %651 = vsyncpa [#allocation4], 1 }
 0x42b   :  { %653 = vsyncpa [#allocation4 + $0x1], 1 }

</bundles_post_ra>
